<compile_context>
chip_gen: v7x
topology: tpu7x:2x2x1
jax: 0.10.0
libtpu: 0.0.40
codegen_flags: <defaults>
</compile_context>

<pallas_src>
import functools

import jax
import jax.numpy as jnp
from jax.experimental import pallas as pl
from jax.experimental.pallas import tpu as pltpu


def _round_up(x, m):
    return ((x + m - 1) // m) * m


# --------------------------------------------------------------------------
# Weight-stationary path: whole (padded) A resident in VMEM, grid over M only.
# --------------------------------------------------------------------------
def _ws_kernel(x_ref, a_ref, o_ref):
    # x_ref: (tm, Kp) bf16   a_ref: (Kp, Np) bf16 (resident)   o_ref: (tm, Np) f32
    o_ref[...] = jnp.dot(x_ref[...], a_ref[...],
                         preferred_element_type=jnp.float32)


@functools.partial(jax.jit, static_argnames=("out_n", "block_m"))
def matmul_xa_ws(x, a_pad, out_n, block_m=1024):
    """x @ a_pad[:K, :out_n] with a weight-stationary Pallas kernel.

    x     : (M, K) float32/bfloat16.
    a_pad : (Kp, Np) bfloat16, already (8,128)-aligned; padded rows/cols are 0.
    out_n : number of valid output columns (<= Np).
    """
    M, K = x.shape
    Kp, Np = a_pad.shape

    def ws_vmem(tm):
        # double-buffered bf16 x tile + bf16 A block + double-buffered f32 out.
        return 2 * tm * Kp * 2 + 2 * Kp * Np * 2 + 2 * tm * Np * 4

    # Pick tm: cap by block_m, shrink (not silently clamp the limit) until the
    # VMEM requirement fits, keep >=2 M tiles for megacore, minimize padding.
    tm = min(block_m, _round_up(M, 8))
    while tm > 8 and ws_vmem(tm) > (40 << 20):
        tm = _round_up(max(tm // 2, 8), 8)
    nmt = pl.cdiv(M, tm)
    if nmt == 1 and M >= 16:
        nmt = 2                       # give the second TensorCore (v7x) work
    tm = _round_up(pl.cdiv(M, nmt), 8)
    Mp = nmt * tm

    xb = x.astype(jnp.bfloat16)       # bf16 feed: halves DMA bytes + 3x MXU rate
    if Mp != M or Kp != K:
        xb = jnp.pad(xb, ((0, Mp - M), (0, Kp - K)))

    out = pl.pallas_call(
        _ws_kernel,
        out_shape=jax.ShapeDtypeStruct((Mp, Np), jnp.float32),
        grid_spec=pltpu.PrefetchScalarGridSpec(
            num_scalar_prefetch=0,
            grid=(nmt,),
            in_specs=[
                pl.BlockSpec((tm, Kp), lambda i: (i, 0)),   # x tile
                pl.BlockSpec((Kp, Np), lambda i: (0, 0)),   # A stays resident
            ],
            out_specs=pl.BlockSpec((tm, Np), lambda i: (i, 0)),
        ),
        compiler_params=pltpu.CompilerParams(
            dimension_semantics=("parallel",),
            vmem_limit_bytes=min(max(ws_vmem(tm) + (4 << 20), 16 << 20), 48 << 20),
        ),
        cost_estimate=pl.CostEstimate(
            flops=2 * Mp * Kp * Np,
            bytes_accessed=Mp * Kp * 2 + Kp * Np * 2 + Mp * Np * 4,
            transcendentals=0),
    )(xb, a_pad)

    if Mp != M or Np != out_n:
        out = out[:M, :out_n]
    return out


# --------------------------------------------------------------------------
# K-tiled fallback (large weights): accumulate f32 directly into the resident
# output block (index_map ignores k; k is the innermost "arbitrary" axis).
# --------------------------------------------------------------------------
def _tiled_kernel(x_ref, a_ref, o_ref):
    partial = jnp.dot(x_ref[...], a_ref[...], preferred_element_type=jnp.float32)

    @pl.when(pl.program_id(2) == 0)
    def _():
        o_ref[...] = partial          # write, not zero-init + add

    @pl.when(pl.program_id(2) > 0)
    def _():
        o_ref[...] += partial


@functools.partial(jax.jit,
                   static_argnames=("out_n", "block_m", "block_n", "block_k"))
def matmul_xa_tiled(x, a, out_n=None, block_m=512, block_n=512, block_k=1024):
    """Tiled Pallas matmul x @ a (bf16 MXU feed, f32 accumulation)."""
    M, K = x.shape
    K2, N = a.shape
    assert K == K2, "inner dims must match"
    if out_n is None:
        out_n = N

    tm = min(block_m, _round_up(M, 8))
    tn = min(block_n, _round_up(N, 128))
    tk = min(block_k, _round_up(K, 128))

    def vmem(tm_, tn_, tk_):
        # double-buffered bf16 x/A tiles + double-buffered f32 output tile.
        return 2 * (tm_ * tk_ * 2 + tk_ * tn_ * 2) + 2 * tm_ * tn_ * 4

    # Shrink tiles (never silently clamp the limit below the requirement).
    while vmem(tm, tn, tk) > (40 << 20):
        if tk > 128:
            tk = _round_up(tk // 2, 128)
        elif tm > 8:
            tm = _round_up(max(tm // 2, 8), 8)
        elif tn > 128:
            tn = _round_up(tn // 2, 128)
        else:
            break

    Np = _round_up(N, tn)
    Kp = _round_up(K, tk)
    nmt = pl.cdiv(M, tm)
    if nmt == 1 and M >= 16 and Np // tn == 1:
        nmt = 2                       # keep both v7x TensorCores busy
    tm = _round_up(pl.cdiv(M, nmt), 8)
    Mp = nmt * tm

    xb = x.astype(jnp.bfloat16)
    ab = a.astype(jnp.bfloat16)
    if Mp != M or Kp != K:
        xb = jnp.pad(xb, ((0, Mp - M), (0, Kp - K)))
    if Kp != K or Np != N:
        ab = jnp.pad(ab, ((0, Kp - K), (0, Np - N)))

    grid = (Mp // tm, Np // tn, Kp // tk)

    out = pl.pallas_call(
        _tiled_kernel,
        out_shape=jax.ShapeDtypeStruct((Mp, Np), jnp.float32),
        grid_spec=pltpu.PrefetchScalarGridSpec(
            num_scalar_prefetch=0,
            grid=grid,
            in_specs=[
                pl.BlockSpec((tm, tk), lambda i, j, k: (i, k)),   # x tile
                pl.BlockSpec((tk, tn), lambda i, j, k: (k, j)),   # A tile
            ],
            out_specs=pl.BlockSpec((tm, tn), lambda i, j, k: (i, j)),
        ),
        compiler_params=pltpu.CompilerParams(
            dimension_semantics=("parallel", "parallel", "arbitrary"),
            vmem_limit_bytes=min(max(vmem(tm, tn, tk) + (4 << 20), 16 << 20),
                                 48 << 20),
        ),
        cost_estimate=pl.CostEstimate(
            flops=2 * Mp * Np * Kp,
            bytes_accessed=Mp * Kp * 2 + Kp * Np * 2 + Mp * Np * 4,
            transcendentals=0),
    )(xb, ab)

    if Mp != M or Np != out_n:
        out = out[:M, :out_n]
    return out


# --------------------------------------------------------------------------
# Module wrapper
# --------------------------------------------------------------------------
class InvertibleLinearMap3Jax:
    """JAX/Pallas port of InvertibleLinearMap3 (forward pass)."""

    _WS_WEIGHT_BYTES = 8 << 20   # hold A resident when its bf16 footprint fits

    def __init__(self, dim, *, key):
        self.dim = dim
        self.A = jax.random.normal(key, (dim, dim), jnp.float32)   # ~ torch.randn
        dp = _round_up(dim, 128)
        # Pre-pad + pre-cast the parameter once (not per call).
        self._A_pad = jnp.pad(self.A.astype(jnp.bfloat16),
                              ((0, dp - dim), (0, dp - dim)))
        # TODO(synk): an in-kernel LU solve has no clean Pallas equivalent;
        # inverse mode precomputes A^{-1} once and reuses the same MXU matmul.
        self._A_inv = jnp.linalg.inv(self.A)
        self._A_inv_pad = jnp.pad(self._A_inv.astype(jnp.bfloat16),
                                  ((0, dp - dim), (0, dp - dim)))

    def _apply(self, x, a_pad, a_full_f32):
        M, K = x.shape
        assert K == self.dim
        # Degenerate shapes: padded MXU tiles + fixed pallas_call/DMA overhead
        # dominate; XLA's fused dot is strictly cheaper there.
        if M < 8 or self.dim < 128:
            return x @ a_full_f32
        if a_pad.size * 2 <= self._WS_WEIGHT_BYTES:
            return matmul_xa_ws(x, a_pad, out_n=self.dim)
        return matmul_xa_tiled(x, a_full_f32, out_n=self.dim)

    def __call__(self, x, mode="direct"):
        assert mode in ("direct", "inverse")
        if mode == "direct":
            return self._apply(x, self._A_pad, self.A)
        # inverse: x @ A^{-1}  (== torch.solve(x.T, A.T)[0].T)
        return self._apply(x, self._A_inv_pad, self._A_inv)


if __name__ == "__main__":
    key = jax.random.PRNGKey(0)
    ka, kx, ka2, kx2 = jax.random.split(key, 4)

    batch, dim = 64, 128
    mod = InvertibleLinearMap3Jax(dim, key=ka)
    x = jax.random.normal(kx, (batch, dim), jnp.float32)

    # --- direct mode: weight-stationary Pallas path (2 M-tiles, A resident) --
    out = jax.block_until_ready(mod(x))
    ref = jnp.dot(x.astype(jnp.bfloat16), mod.A.astype(jnp.bfloat16),
                  preferred_element_type=jnp.float32)
    assert out.shape == (batch, dim)
    assert jnp.allclose(out, ref, atol=1e-1, rtol=1e-2), "direct mode mismatch"

    # Ragged batch: exercises M padding + the 2-tile megacore split.
    out_r = jax.block_until_ready(mod(x[:50]))
    ref_r = jnp.dot(x[:50].astype(jnp.bfloat16), mod.A.astype(jnp.bfloat16),
                    preferred_element_type=jnp.float32)
    assert out_r.shape == (50, dim)
    assert jnp.allclose(out_r, ref_r, atol=1e-1, rtol=1e-2), "ragged mismatch"

    # --- K-tiled fallback kernel: small blocks force a real (2, 2, 2) grid ---
    dim2 = 256
    a2 = jax.random.normal(ka2, (dim2, dim2), jnp.float32)
    x2 = jax.random.normal(kx2, (72, dim2), jnp.float32)     # ragged M as well
    out2 = jax.block_until_ready(
        matmul_xa_tiled(x2, a2, out_n=dim2, block_m=64, block_n=128, block_k=128))
    ref2 = jnp.dot(x2.astype(jnp.bfloat16), a2.astype(jnp.bfloat16),
                   preferred_element_type=jnp.float32)
    assert out2.shape == (72, dim2)
    assert jnp.allclose(out2, ref2, atol=1e-1, rtol=1e-2), "tiled/padded mismatch"

    # --- inverse mode (x @ A^{-1} via the same Pallas matmul) ----------------
    inv = jax.block_until_ready(mod(out, mode="inverse"))
    assert inv.shape == (batch, dim)
    assert bool(jnp.all(jnp.isfinite(inv)))

    print("KERNEL_OK")
</pallas_src>

<mosaic_0001>
module attributes {stable_mosaic.version = 11 : i64} {
  func.func @_ws_kernel(%arg0: i32, %arg1: memref<32x128xbf16, #tpu.memory_space<vmem>>, %arg2: memref<128x128xbf16, #tpu.memory_space<vmem>>, %arg3: memref<32x128xf32, #tpu.memory_space<vmem>>) attributes {dimension_semantics = [#tpu.dimension_semantics<parallel>], iteration_bounds = array<i64: 2>, scalar_prefetch = 0 : i64, scratch_operands = 0 : i64, tpu.core_type = #tpu.core_type<tc>, window_params = [{transform_indices = @transform_0, window_bounds = array<i64: 32, 128>}, {pipeline_mode = #tpu.pipeline_mode<synchronous>, transform_indices = @transform_1, window_bounds = array<i64: 128, 128>}, {transform_indices = @transform_2, window_bounds = array<i64: 32, 128>}]} {
    %c0 = arith.constant 0 : index
    %c0_0 = arith.constant 0 : index
    %0 = vector.load %arg1[%c0, %c0_0] : memref<32x128xbf16, #tpu.memory_space<vmem>>, vector<32x128xbf16>
    %c0_1 = arith.constant 0 : index
    %c0_2 = arith.constant 0 : index
    %1 = vector.load %arg2[%c0_1, %c0_2] : memref<128x128xbf16, #tpu.memory_space<vmem>>, vector<128x128xbf16>
    %cst = arith.constant dense<0.000000e+00> : vector<32x128xf32>
    %2 = tpu.matmul %0, %1, %cst {dimension_numbers = #tpu.dot_dimension_numbers<[1], [0], [0], [1], [0, 0, 1, 1], [], []>} : vector<32x128xbf16>, vector<128x128xbf16>, vector<32x128xf32> -> vector<32x128xf32>
    %c0_3 = arith.constant 0 : index
    %c0_4 = arith.constant 0 : index
    %3 = vector.load %arg3[%c0_3, %c0_4] : memref<32x128xf32, #tpu.memory_space<vmem>>, vector<32x128xf32>
    tpu.vector_store %arg3[%c0_3, %c0_4], %2 {strides = array<i32>} : memref<32x128xf32, #tpu.memory_space<vmem>>, vector<32x128xf32>,
    return
  }
  func.func @transform_0(%arg0: i32) -> (i32, i32) {
    %c0_i32 = arith.constant 0 : i32
    %c0_i32_0 = arith.constant 0 : i32
    return %arg0, %c0_i32 : i32, i32
  }
  func.func @transform_1(%arg0: i32) -> (i32, i32) {
    %c0_i32 = arith.constant 0 : i32
    %c0_i32_0 = arith.constant 0 : i32
    %c0_i32_1 = arith.constant 0 : i32
    return %c0_i32, %c0_i32_0 : i32, i32
  }
  func.func @transform_2(%arg0: i32) -> (i32, i32) {
    %c0_i32 = arith.constant 0 : i32
    %c0_i32_0 = arith.constant 0 : i32
    return %arg0, %c0_i32 : i32, i32
  }
}

</mosaic_0001>

<bundles_post_ra>
// kernel: matmul_xa_ws.1
= control target key start
LH: loop header
LB: loop body
LE: loop exit
PB: predicated region body
PF: predicated region fallthrough
CT: control target
= control target key end

     0   :  { %7 = vsyncpa [#allocation3], 0  ;;  %s667_s0 = inlined_call_operand.vmem [shape: bf16[64,128], index: 0, kind: input, shape index: {}]   ;;  %s668_s1 = inlined_call_operand.vmem [shape: bf16[128,128], index: 1, kind: input, shape index: {}]   ;;  %s669_s2 = inlined_call_operand.hbm [shape: f32[64,128], index: 2, kind: output, shape index: {}]  }
   0x1   :  { %9 = vsyncpa [#allocation3 + $0x1], 0  ;;  %s541_s9 = smov 0   ;;  %s543_s10 = smov 0  }
   0x2   :  { %s545_s11 = smov 0   ;;  %s547_s12 = smov 0  }
   0x3 LB: > { %s562_s13 = sadd.s32 4294967295, %s521_s12   ;;  %s355_s14 = sadd.s32 4294967294, %s521_s12   ;;  %s521_s12 = sphi %s547_s12, %s675_s12   ;;  %s517_s11 = sphi %s545_s11, %s674_s11   ;;  %s513_s10 = sphi %s543_s10, %s673_s10   ;;  %s509_s9 = sphi %s541_s9, %s672_s9  }
   0x4   : > { %s566_s15 = sadd.s32 1, %s521_s12   ;;  %s69_s16 = sadd.s32 1, %s517_s11 }
   0x5   : > { %s66_s17 = ssub.s32 %s521_s12, %s566_s15  ;;  %p79_p0 = scmp.ne.s32.totalorder %s517_s11, %s513_s10 }
   0x6   : > { %p67_p1 = scmp.eq.s32.totalorder %s66_s17, 0  ;;  %p80_p2 = scmp.eq.s32.totalorder %s562_s13, 1 }
   0x7   : > { %p85_p3 = scmp.ne.s32.totalorder %s513_s10, %s509_s9  ;;  %p86_p4 = scmp.eq.s32.totalorder %s355_s14, 1 }
   0x8   : > { %s577_s18 = scalar_select %p67_p1, %s517_s11, %s69_s16  }
   0x9   : > { %p579_p5 = por %p80_p2, %p79_p0  ;;  %p583_p6 = por %p86_p4, %p85_p3 }
   0xa   : > { %p358_p7 = scmp.ge.s32.totalorder %s521_s12, 1  ;;  %p116_p8 = scmp.lt.s32.totalorder %s521_s12, 3 }
   0xc   : > { %p117_p9 = pnand %p358_p7, %p116_p8 }
   0xd   : > { %v449_v0 = vld [vmem:[%s668_s1] sm:$0xff] (!%p117_p9)   ;;  %s360_s23 = sshll.u32 (!%p117_p9), %s562_s13, 2  ;;  %v450_v1 = vld [vmem:[%s668_s1 + $0x8] sm:$0xff] (!%p117_p9)   ;;  %v451_v2 = vld [vmem:[%s668_s1 + $0x10] sm:$0xff] (!%p117_p9)   ;;  %s377_s27 = sshll.u32 (!%p117_p9), %s562_s13, 9 }
   0xe   : > { %120 = sbr.rel (%p117_p9) target bundleno = 276 (0x114), region = 28  ;;  %p139_p10 = scmp.lt.s32.totalorder (!%p117_p9), %s360_s23, 7  ;;  %388 = vmatprep.subr.bf16.mxu0 (!%p117_p9), %v449_v0  ;;  %v452_v3 = vld [vmem:[%s668_s1 + $0x18] sm:$0xff] (!%p117_p9)   ;;  %v453_v5 = vld [vmem:[%s668_s1 + $0x20] sm:$0xff] (!%p117_p9)   ;;  %v454_v6 = vld [vmem:[%s668_s1 + $0x28] sm:$0xff] (!%p117_p9)  }
   0xf   : > { %389 = vmatpush3.bf16.msra.mxu0 (!%p117_p9), %v449_v0  ;;  %v455_v7 = vld [vmem:[%s668_s1 + $0x30] sm:$0xff] (!%p117_p9)   ;;  %v456_v8 = vld [vmem:[%s668_s1 + $0x38] sm:$0xff] (!%p117_p9)   ;;  %s624_s30 = scalar_lea.hbm (!%p117_p9), %s669_s2, %s377_s27  ;;  %s523_s4 = smov (!%p117_p9), [#allocation2]  }
  0x10   : > { %390 = vmatprep.subr.bf16.mxu0 (!%p117_p9), %v450_v1  ;;  %s463_s5 = sshll.u32 (!%p117_p9), %s523_s4, 4  ;;  %s464_s5 = int_to_ptr.vmem [resolvable:$false] %s463_s5 }
  0x11   : > { %s465_s6 = scalar_lea.vmem (!%p117_p9), %s464_s5, 1024 }
  0x13   : > { %391 = vmatpush3.bf16.msra.mxu0 (!%p117_p9), %v450_v1 }
  0x14   : > { %392 = vmatprep.subr.bf16.mxu0 (!%p117_p9), %v451_v2 }
  0x15   : > { %s677_s23 = smov (!%p139_p10, %s360_s23), 7 }
  0x16   : > { %s361_s28 = sshll.u32 %s677_s23, 2  ;;  %s135_s23 = sand.u32 1, %s513_s10  }
  0x17   : > { %s142_s3 = scalar_lea.vmem %s667_s0, %s361_s28  ;;  %393 = vmatpush3.bf16.msra.mxu0 %v451_v2  ;;  %s359_s24 = sshll.u32 %s135_s23, 5 }
  0x18   : > { %v457_v4 = vld [vmem:[%s142_s3] sm:$0xff]   ;;  %394 = vmatprep.subr.bf16.mxu0 %v452_v3  ;;  %v458_v9 = vld [vmem:[%s142_s3 + $0x8] sm:$0xff]   ;;  %s137_s25 = scalar_lea.vmem [#allocation2], %s359_s24  ;;  %s626_s3 = scalar_lea.sflag [#allocation3], %s135_s23 }
  0x19   : > { %404 = vmatprep.mubr.bf16.mxu0 %v457_v4  ;;  %s293_s26 = sshll.u32 %s137_s25, 4  ;;  %s619_s26 = int_to_ptr.vmem [resolvable:$true] %s293_s26 }
  0x1a   : > { %s459_s13 = scalar_lea.vmem %s619_s26, 512  ;;  %p466_p0 = scmp.lt.s32.totalorder %s619_s26, %s464_s5 }
  0x1b   : > { %395 = vmatpush3.bf16.msra.mxu0 %v452_v3  ;;  %p460_p11 = scmp.ne.s32.totalorder %s619_s26, %s459_s13  ;;  %p467_p1 = scmp.lt.s32.totalorder %s465_s6, %s459_s13 }
  0x1c   : > { %396 = vmatprep.subr.bf16.mxu0 %v453_v5 }
  0x1d   : > { %p461_p12 = pnand %p460_p11, %p579_p5  ;;  %p468_p2 = por %p467_p1, %p466_p0 }
  0x1f   : > { %397 = vmatpush3.bf16.msra.mxu0 %v453_v5  ;;  %p462_p13 = pneg %p461_p12 }
  0x20   : > { %398 = vmatprep.subr.bf16.mxu0 %v454_v6 }
  0x21   : > { %p469_p3 = pnand %p468_p2, %p462_p13 }
  0x23   : > { %399 = vmatpush3.bf16.msra.mxu0 %v454_v6 }
  0x24   : > { %400 = vmatprep.subr.bf16.mxu0 %v455_v7 }
  0x27   : > { %401 = vmatpush3.bf16.msra.mxu0 %v455_v7 }
  0x28   : > { %402 = vmatprep.subr.bf16.mxu0 %v456_v8 }
  0x2b   : > { %403 = vmatpush3.bf16.msra.mxu0 %v456_v8 }
  0x2e   : > { %405 = vmatmul.mubr.bf16.vlgmr.msra.gmra.mrb[0].mxu0 %v458_v9 }
 0x101   : > { %v406_v10 = vpop.f32.mrb[0].mxu0 }
 0x102   : > { %277 = vst [vmem:[%s137_s25 + $0x10] sm:$0xff] %v406_v10  ;;  %v260_v11 = vpop.f32.mrb[1].mxu0 }
 0x103   : > { %275 = vst [vmem:[%s137_s25] sm:$0xff] %v260_v11  ;;  %v407_v12 = vpop.f32.mrb[2].mxu0 }
 0x104   : > { %278 = vst [vmem:[%s137_s25 + $0x18] sm:$0xff] %v407_v12  ;;  %v263_v13 = vpop.f32.mrb[3].mxu0 }
 0x105   : > { %276 = vst [vmem:[%s137_s25 + $0x8] sm:$0xff] %v263_v13 }
 0x106   : > { %472 = shalt.err (!%p469_p3)
}
 0x107   : > { %s473_s7 = scalar_lea.hbm %s624_s30, 512  ;;  %s477_s16 = scalar_lea.hbm %s669_s2, 1024 }
 0x108   : > { %p474_p4 = scmp.ne.s32.totalorder %s624_s30, %s473_s7  ;;  %p478_p9 = scmp.lt.u32.totalorder %s624_s30, %s669_s2 }
 0x109   : > { %p479_p10 = scmp.lt.u32.totalorder %s477_s16, %s473_s7  ;;  %p481_p12 = scmp.lt.u32.totalorder %s473_s7, %s624_s30 }
 0x10a   : > { %p475_p7 = pnand %p474_p4, %p579_p5 }
 0x10b   : > { %p480_p11 = por %p479_p10, %p478_p9 }
 0x10c   : > { %p476_p8 = pneg %p475_p7 }
 0x10d   : > { %p482_p13 = por %p481_p12, %p480_p11 }
 0x10f   : > { %p483_p0 = pnand %p482_p13, %p476_p8 }
 0x111   : > { %486 = shalt.err (!%p483_p0)
}
 0x112   : > { %s524_s22 = smov 128   ;;  %s525_s23 = smov 8  }
 0x113   : > { %408 = dma.vmem_to_hbm [thread:$0]  (%p579_p5), %s619_s26, 512, %s624_s30, %s626_s3, %s524_s22, %s524_s22, %s525_s23  }
 0x114 PF: > { %p414_p1 = scmp.ge.s32.totalorder %s521_s12, 2  ;;  %s308_s24 = sand.u32 1, %s509_s9  }
 0x115   : > { %s309_s25 = scalar_lea.sflag [#allocation3], %s308_s24 }
 0x116   : > { %p411_p2 = pnand %p414_p1, %p583_p6 }
 0x118   : > { %504 = dma.done.wait (!%p411_p2), %s309_s25, 512  }
 0x119   : > { %506 = vsyncadd (!%p411_p2), %s309_s25, 4294966784  ;;  %p12_p3 = scmp.ge.s32.totalorder %s566_s15, 4   ;;  %s672_s9 = smov %s513_s10 }
 0x11a   : > { %s673_s10 = smov %s517_s11  ;;  %s674_s11 = smov %s577_s18 }
 0x11b   : > { %s675_s12 = smov %s566_s15  ;;  %14 = sbr.rel (!%p12_p3) target bundleno = 3 (0x3), region = 63 }
 0x122   :  { %314 = vsyncpa [#allocation3], 1 }
 0x123   :  { %316 = vsyncpa [#allocation3 + $0x1], 1 }

</bundles_post_ra>
